<compile_context>
chip_gen: v5e
topology: v5e:2x2
jax: 0.10.0
libtpu: 0.0.40
codegen_flags: <defaults>
</compile_context>

<pallas_src>
import jax
import jax.numpy as jnp
from jax.experimental import pallas as pl
from jax.experimental.pallas import tpu as pltpu


def _identity_kernel(x_ref, o_ref):
    # Straight VMEM tile copy: load full block, store full block (unmasked,
    # lane-dense stores since the last dim is exactly 128).
    o_ref[...] = x_ref[...]


def identity(x):
    """Pallas TPU implementation of nn.Identity: returns a copy equal to x."""
    orig_shape = x.shape
    dtype = x.dtype
    n = x.size
    if n == 0:
        return x

    LANE = 128
    itemsize = jnp.dtype(dtype).itemsize
    # Sub-32-bit dtypes pack along sublanes: keep tile rows a multiple of
    # 8 * packing so the (8,128)-derived layout constraint is satisfied.
    packing = max(1, 4 // itemsize)
    sublane = 8 * packing

    # Lane-dense 2-D slab: (rows, 128). Only pad the <128-element lane tail.
    rows = pl.cdiv(n, LANE)
    pad_tail = rows * LANE - n  # always < 128

    flat = x.reshape(-1)
    if pad_tail:
        flat = jnp.pad(flat, (0, pad_tail))
    x2d = flat.reshape(rows, LANE)

    # Tile rows: ~2 MiB blocks (in+out double-buffered -> ~8 MiB working set,
    # comfortably under v5e's 16 MiB scoped default and v7x's smaller VMEM).
    TARGET_BLOCK_BYTES = 2 * 1024 * 1024
    tm_max = max(sublane,
                 (TARGET_BLOCK_BYTES // (LANE * itemsize)) // sublane * sublane)

    if rows <= tm_max:
        # Whole array fits in one block (tiny input): single grid step.
        tm = pl.cdiv(rows, sublane) * sublane
    else:
        # Multi-block input: ensure >= 4 grid steps so both v7x TensorCores
        # get tiles; ragged last block is handled by Pallas (no row padding).
        MIN_BLOCKS = 4
        tm_target = pl.cdiv(pl.cdiv(rows, MIN_BLOCKS), sublane) * sublane
        tm = max(sublane, min(tm_max, tm_target))

    grid = (pl.cdiv(rows, tm),)

    block_bytes = tm * LANE * itemsize
    # 2 buffers each for input and output, plus slack; clamp for safety.
    vmem_limit = int(min(32 * 1024 * 1024, max(4 * 1024 * 1024, 5 * block_bytes)))

    out2d = pl.pallas_call(
        _identity_kernel,
        out_shape=jax.ShapeDtypeStruct((rows, LANE), dtype),
        grid=grid,
        in_specs=[pl.BlockSpec((tm, LANE), lambda i: (i, 0))],
        out_specs=pl.BlockSpec((tm, LANE), lambda i: (i, 0)),
        # Identity: alias the output onto the (temporary) input slab — no
        # separate output HBM allocation.
        input_output_aliases={0: 0},
        compiler_params=pltpu.CompilerParams(
            dimension_semantics=("parallel",),
            vmem_limit_bytes=vmem_limit,
        ),
    )(x2d)

    y = out2d.reshape(-1)
    if pad_tail:
        y = y[:n]
    return y.reshape(orig_shape)


if __name__ == "__main__":
    key = jax.random.PRNGKey(0)
    # Small shape consistent with the module's forward (any tensor works).
    x = jax.random.normal(key, (2, 4, 16, 16), dtype=jnp.float32)

    y = identity(x)
    y = jax.block_until_ready(y)

    assert y.shape == x.shape, (y.shape, x.shape)
    assert y.dtype == x.dtype, (y.dtype, x.dtype)
    assert jnp.array_equal(y, x), "Identity output does not match input"

    # Also exercise a non-multiple-of-128 / ragged-last-block path once.
    x2 = jax.random.normal(jax.random.PRNGKey(0), (3, 5, 7), dtype=jnp.float32)
    y2 = jax.block_until_ready(identity(x2))
    assert y2.shape == x2.shape and jnp.array_equal(y2, x2)

    print("KERNEL_OK")
</pallas_src>

<mosaic_0001>
module attributes {stable_mosaic.version = 11 : i64} {
  func.func @_identity_kernel(%arg0: i32, %arg1: memref<16x128xf32, #tpu.memory_space<vmem>>, %arg2: memref<16x128xf32, #tpu.memory_space<vmem>>) attributes {dimension_semantics = [#tpu.dimension_semantics<parallel>], iteration_bounds = array<i64: 1>, scalar_prefetch = 0 : i64, scratch_operands = 0 : i64, tpu.core_type = #tpu.core_type<tc>, window_params = [{transform_indices = @transform_0, window_bounds = array<i64: 16, 128>}, {transform_indices = @transform_1, window_bounds = array<i64: 16, 128>}]} {
    %c0 = arith.constant 0 : index
    %c0_0 = arith.constant 0 : index
    %0 = vector.load %arg1[%c0, %c0_0] : memref<16x128xf32, #tpu.memory_space<vmem>>, vector<16x128xf32>
    %c0_1 = arith.constant 0 : index
    %c0_2 = arith.constant 0 : index
    %1 = vector.load %arg2[%c0_1, %c0_2] : memref<16x128xf32, #tpu.memory_space<vmem>>, vector<16x128xf32>
    tpu.vector_store %arg2[%c0_1, %c0_2], %0 {strides = array<i32>} : memref<16x128xf32, #tpu.memory_space<vmem>>, vector<16x128xf32>,
    return
  }
  func.func @transform_0(%arg0: i32) -> (i32, i32) {
    %c0_i32 = arith.constant 0 : i32
    %c0_i32_0 = arith.constant 0 : i32
    return %arg0, %c0_i32 : i32, i32
  }
  func.func @transform_1(%arg0: i32) -> (i32, i32) {
    %c0_i32 = arith.constant 0 : i32
    %c0_i32_0 = arith.constant 0 : i32
    return %arg0, %c0_i32 : i32, i32
  }
}

</mosaic_0001>

<bundles_post_ra>
// kernel: tpu_custom_call.1
= control target key start
LH: loop header
LB: loop body
LE: loop exit
PB: predicated region body
PF: predicated region fallthrough
CT: control target
= control target key end

     0   :  { %6 = vsyncpa [#allocation3], 0  ;;  %s124_s0 = inlined_call_operand.hbm [shape: f32[16,128], index: 0, kind: input, shape index: {}, may-alias: {0,1}]   ;;  %s125_s1 = inlined_call_operand.hbm [shape: f32[16,128], index: 1, kind: output, shape index: {}, may-alias: {0,1}]  }
   0x1   :  { %7 = vsyncpa [#allocation4], 0  ;;  %s12_s8 = sshll.u32 %s124_s0, 4  ;;  %s104_s9 = smov [#allocation2]   ;;  %s13_s8 = int_to_ptr.hbm [resolvable:$true] %s12_s8 }
   0x2   :  { %s14_s10 = sshll.u32 %s104_s9, 4  ;;  %s105_s11 = smov 128   ;;  %s15_s10 = int_to_ptr.vmem [resolvable:$true] %s14_s10 }
   0x3   :  { %s106_s12 = smov 8  }
   0x4   :  { %20 = dma.hbm_to_vmem [thread:$0]  %s13_s8, 256, %s15_s10, [#allocation3], %s105_s11, %s105_s11, %s106_s12  }
   0x5   :  { %100 = dma.done.wait [#allocation3], 256  }
   0x6   :  { %101 = vsyncadd [#allocation3], 4294967040  ;;  %s107_s13 = smov [#allocation5]   ;;  %s35_s17 = sshll.u32 %s125_s1, 4  ;;  %v25_v0 = vld [vmem:[#allocation2] sm:$0xff]  ;;  %v26_v1 = vld [vmem:[#allocation2 + $0x8] sm:$0xff]  ;;  %s36_s17 = int_to_ptr.hbm [resolvable:$true] %s35_s17 }
   0x7   :  { %s33_s14 = sshll.u32 %s107_s13, 4  ;;  %27 = vst [vmem:[#allocation5] sm:$0xff] %v25_v0  ;;  %s34_s14 = int_to_ptr.vmem [resolvable:$true] %s33_s14 }
   0x8   :  { %28 = vst [vmem:[#allocation5 + $0x8] sm:$0xff] %v26_v1 }
   0x9   :  { %41 = dma.vmem_to_hbm [thread:$0]  %s34_s14, 256, %s36_s17, [#allocation4], %s105_s11, %s105_s11, %s106_s12  }
   0xa   :  { %102 = dma.done.wait [#allocation4], 256  }
   0xb   :  { %103 = vsyncadd [#allocation4], 4294967040 }
   0xc   :  { %46 = vsyncpa [#allocation3], 1 }
   0xd   :  { %47 = vsyncpa [#allocation4], 1 }

</bundles_post_ra>
